<compile_context>
chip_gen: v7x
topology: tpu7x:2x2x1
jax: 0.10.0
libtpu: 0.0.40
codegen_flags: <defaults>
</compile_context>

<pallas_src>
import functools

import jax
import jax.numpy as jnp
from jax import lax
from jax.experimental import pallas as pl
from jax.experimental.pallas import tpu as pltpu


# ---------------------------------------------------------------------------
# Kernels
# ---------------------------------------------------------------------------
def _conv_stats_kernel(p_ref, w_ref, b_ref, y_ref, sum_ref, ssq_ref, *,
                       p_valid, tile_p):
    """Pass 1: conv (matmul) + bias, plus per-channel sum / sum-of-squares.

    p_ref:   (K, TP)      bf16  patches tile for one sample
    w_ref:   (C_out, K)   bf16  weight matrix
    b_ref:   (C_out, 1)   f32   bias column
    y_ref:   (C_out, TP)  f32   un-normalized conv output tile
    sum_ref: (C_out, 1)   f32   per-channel running sum  (resident across P)
    ssq_ref: (C_out, 1)   f32   per-channel running sum of squares
    """
    pt = pl.program_id(1)

    y = jnp.dot(w_ref[...], p_ref[...], preferred_element_type=jnp.float32)
    y = y + b_ref[...]

    # Mask out lanes beyond the true P (padding columns) for the statistics.
    col = pt * tile_p + lax.broadcasted_iota(jnp.int32, y.shape, 1)
    ym = jnp.where(col < p_valid, y, 0.0)

    @pl.when(pt == 0)
    def _init():
        sum_ref[...] = jnp.zeros_like(sum_ref)
        ssq_ref[...] = jnp.zeros_like(ssq_ref)

    sum_ref[...] += jnp.sum(ym, axis=1, keepdims=True)
    ssq_ref[...] += jnp.sum(ym * ym, axis=1, keepdims=True)

    y_ref[...] = y


def _gn_relu_kernel(y_ref, scale_ref, shift_ref, o_ref):
    """Pass 2: folded GroupNorm affine + ReLU.

    y_ref: (C_out, TP) f32; scale_ref/shift_ref: (C_out, 1) f32.
    """
    o_ref[...] = jnp.maximum(y_ref[...] * scale_ref[...] + shift_ref[...], 0.0)


# ---------------------------------------------------------------------------
# Host-side helpers
# ---------------------------------------------------------------------------
def _im2col_nkp(x, kernel_size, stride, dilation, padding):
    """x: [N, C, H, W] -> patches [N, C*KH*KW, H_out*W_out] (c, kh, kw order)."""
    N, C, H, W = x.shape
    KH = KW = kernel_size
    H_out = (H + 2 * padding - dilation * (KH - 1) - 1) // stride + 1
    W_out = (W + 2 * padding - dilation * (KW - 1) - 1) // stride + 1
    xp = jnp.pad(x, ((0, 0), (0, 0), (padding, padding), (padding, padding)))

    slabs = []
    for kh in range(KH):
        for kw in range(KW):
            h0 = kh * dilation
            w0 = kw * dilation
            sl = xp[:, :,
                    h0:h0 + (H_out - 1) * stride + 1:stride,
                    w0:w0 + (W_out - 1) * stride + 1:stride]  # [N, C, Ho, Wo]
            slabs.append(sl)
    patches = jnp.stack(slabs, axis=2)                        # [N, C, KH*KW, Ho, Wo]
    patches = patches.reshape(N, C * KH * KW, H_out * W_out)  # [N, K, P]
    return patches, H_out, W_out


@functools.partial(
    jax.jit,
    static_argnames=("kernel_size", "stride", "dilation", "eps", "tile_p"))
def conv_gn_relu(x, weight, bias, gamma, beta, *, kernel_size, stride, dilation,
                 eps=1e-5, tile_p=512):
    """x: [N, C_in, H, W] (NCHW). weight: [C_out, C_in, KH, KW]. Returns NCHW."""
    N, C_in, H, W = x.shape
    C_out = weight.shape[0]
    padding = dilation  # matches nn.Conv2d(..., padding=dilation, dilation=dilation)

    # im2col in bf16 (halves the KH*KW-amplified patch bytes), layout [N, K, P].
    patches, H_out, W_out = _im2col_nkp(
        x.astype(jnp.bfloat16), kernel_size, stride, dilation, padding)
    P = H_out * W_out
    K = C_in * kernel_size * kernel_size

    # Lane-aligned P tile (multiple of 128), P padded up to a whole tile count.
    tp = max(128, (min(tile_p, pl.cdiv(P, 128) * 128) // 128) * 128)
    num_p = pl.cdiv(P, tp)
    P_pad = num_p * tp
    if P_pad != P:
        patches = jnp.pad(patches, ((0, 0), (0, 0), (0, P_pad - P)))

    w_mat = weight.reshape(C_out, K).astype(jnp.bfloat16)   # [C_out, K]
    b_col = bias.reshape(C_out, 1).astype(jnp.float32)

    kernel1 = functools.partial(_conv_stats_kernel, p_valid=P, tile_p=tp)
    cost1 = pl.CostEstimate(
        flops=2 * N * P_pad * K * C_out,
        transcendentals=0,
        bytes_accessed=(patches.size * 2 + w_mat.size * 2
                        + (N * C_out * P_pad + 2 * N * C_out) * 4))

    y, csum, cssq = pl.pallas_call(
        kernel1,
        out_shape=(
            jax.ShapeDtypeStruct((N, C_out, P_pad), jnp.float32),
            jax.ShapeDtypeStruct((N, C_out, 1), jnp.float32),
            jax.ShapeDtypeStruct((N, C_out, 1), jnp.float32),
        ),
        grid_spec=pltpu.PrefetchScalarGridSpec(
            num_scalar_prefetch=0,
            grid=(N, num_p),
            in_specs=[
                pl.BlockSpec((None, K, tp), lambda n, p: (n, 0, p)),
                pl.BlockSpec((C_out, K), lambda n, p: (0, 0)),
                pl.BlockSpec((C_out, 1), lambda n, p: (0, 0)),
            ],
            out_specs=(
                pl.BlockSpec((None, C_out, tp), lambda n, p: (n, 0, p)),
                pl.BlockSpec((None, C_out, 1), lambda n, p: (n, 0, 0)),
                pl.BlockSpec((None, C_out, 1), lambda n, p: (n, 0, 0)),
            ),
        ),
        compiler_params=pltpu.CompilerParams(
            dimension_semantics=("parallel", "arbitrary"),
            vmem_limit_bytes=32 * 1024 * 1024),
        cost_estimate=cost1,
    )(patches, w_mat, b_col)

    # Fold GroupNorm(1 group) into per-(sample, channel) scale/shift (tiny JAX op).
    count = jnp.float32(C_out * P)
    total = jnp.sum(csum[:, :, 0], axis=1)                 # [N]
    total_sq = jnp.sum(cssq[:, :, 0], axis=1)              # [N]
    mean = total / count
    var = jnp.maximum(total_sq / count - mean * mean, 0.0)
    rstd = lax.rsqrt(var + eps)
    scale = gamma.astype(jnp.float32)[None, :] * rstd[:, None]           # [N, C_out]
    shift = beta.astype(jnp.float32)[None, :] - mean[:, None] * scale    # [N, C_out]
    scale = scale[:, :, None]                                            # [N, C_out, 1]
    shift = shift[:, :, None]

    cost2 = pl.CostEstimate(
        flops=3 * N * C_out * P_pad,
        transcendentals=0,
        bytes_accessed=2 * N * C_out * P_pad * 4)

    out_flat = pl.pallas_call(
        _gn_relu_kernel,
        out_shape=jax.ShapeDtypeStruct((N, C_out, P_pad), jnp.float32),
        grid_spec=pltpu.PrefetchScalarGridSpec(
            num_scalar_prefetch=0,
            grid=(N, num_p),
            in_specs=[
                pl.BlockSpec((None, C_out, tp), lambda n, p: (n, 0, p)),
                pl.BlockSpec((None, C_out, 1), lambda n, p: (n, 0, 0)),
                pl.BlockSpec((None, C_out, 1), lambda n, p: (n, 0, 0)),
            ],
            out_specs=pl.BlockSpec((None, C_out, tp), lambda n, p: (n, 0, p)),
        ),
        compiler_params=pltpu.CompilerParams(
            dimension_semantics=("parallel", "parallel"),
            vmem_limit_bytes=32 * 1024 * 1024),
        cost_estimate=cost2,
    )(y, scale, shift)

    # Lane-dense [N, C_out, P] slab -> NCHW with no transpose.
    out = out_flat[:, :, :P].reshape(N, C_out, H_out, W_out)
    return out.astype(x.dtype)


# ---------------------------------------------------------------------------
# Reference + self-test
# ---------------------------------------------------------------------------
def _reference(x, weight, bias, gamma, beta, *, kernel_size, stride, dilation,
               eps=1e-5, quantize_bf16=False):
    del kernel_size  # implied by weight shape
    padding = dilation
    xc, wc = x, weight
    if quantize_bf16:
        xc = xc.astype(jnp.bfloat16).astype(jnp.float32)
        wc = wc.astype(jnp.bfloat16).astype(jnp.float32)
    y = lax.conv_general_dilated(
        xc, wc,
        window_strides=(stride, stride),
        padding=((padding, padding), (padding, padding)),
        rhs_dilation=(dilation, dilation),
        dimension_numbers=("NCHW", "OIHW", "NCHW"),
        precision=lax.Precision.HIGHEST)
    y = y + bias[None, :, None, None]
    mean = jnp.mean(y, axis=(1, 2, 3), keepdims=True)
    var = jnp.mean((y - mean) ** 2, axis=(1, 2, 3), keepdims=True)
    yhat = (y - mean) / jnp.sqrt(var + eps)
    out = yhat * gamma[None, :, None, None] + beta[None, :, None, None]
    return jnp.maximum(out, 0.0)


if __name__ == "__main__":
    def _run_case(case_idx, N, C_in, H, W, C_out, kernel_size, stride, dilation,
                  tile_p):
        key = jax.random.fold_in(jax.random.PRNGKey(0), case_idx)
        kx, kw, kb, kg, kbt = jax.random.split(key, 5)
        x = jax.random.normal(kx, (N, C_in, H, W), dtype=jnp.float32)
        weight = 0.1 * jax.random.normal(
            kw, (C_out, C_in, kernel_size, kernel_size), dtype=jnp.float32)
        bias = 0.1 * jax.random.normal(kb, (C_out,), dtype=jnp.float32)
        gamma = 1.0 + 0.1 * jax.random.normal(kg, (C_out,), dtype=jnp.float32)
        beta = 0.1 * jax.random.normal(kbt, (C_out,), dtype=jnp.float32)

        out = conv_gn_relu(x, weight, bias, gamma, beta,
                           kernel_size=kernel_size, stride=stride,
                           dilation=dilation, tile_p=tile_p)
        out = jax.block_until_ready(out)

        ref_q = _reference(x, weight, bias, gamma, beta, kernel_size=kernel_size,
                           stride=stride, dilation=dilation, quantize_bf16=True)
        ref_f = _reference(x, weight, bias, gamma, beta, kernel_size=kernel_size,
                           stride=stride, dilation=dilation, quantize_bf16=False)
        assert out.shape == ref_f.shape, (out.shape, ref_f.shape)
        # Tight check against a reference that uses the same bf16 matmul operands.
        err_q = float(jnp.max(jnp.abs(out - ref_q)))
        assert err_q < 2e-3, f"case {case_idx}: bf16-matched err {err_q}"
        # Looser sanity check against the pure-f32 reference (bf16 operand rounding).
        err_f = float(jnp.max(jnp.abs(out - ref_f)))
        assert err_f < 5e-2, f"case {case_idx}: f32 err {err_f}"

    # Case 0: P = 256 -> two 128-wide P tiles (exercises the cross-tile GN accumulator).
    _run_case(0, N=2, C_in=4, H=16, W=16, C_out=8, kernel_size=3, stride=1,
              dilation=1, tile_p=128)
    # Case 1: strided + dilated, P = 81 -> padded to 128 (exercises the lane mask).
    _run_case(1, N=1, C_in=3, H=18, W=18, C_out=8, kernel_size=3, stride=2,
              dilation=2, tile_p=128)

    print("KERNEL_OK")
</pallas_src>

<mosaic_0001>
module attributes {stable_mosaic.version = 11 : i64} {
  func.func @_conv_stats_kernel(%arg0: i32, %arg1: i32, %arg2: memref<1x36x128xbf16, #tpu.memory_space<vmem>>, %arg3: memref<8x36xbf16, #tpu.memory_space<vmem>>, %arg4: memref<8x1xf32, #tpu.memory_space<vmem>>, %arg5: memref<1x8x128xf32, #tpu.memory_space<vmem>>, %arg6: memref<1x8x1xf32, #tpu.memory_space<vmem>>, %arg7: memref<1x8x1xf32, #tpu.memory_space<vmem>>) attributes {dimension_semantics = [#tpu.dimension_semantics<parallel>, #tpu.dimension_semantics<arbitrary>], iteration_bounds = array<i64: 2, 2>, scalar_prefetch = 0 : i64, scratch_operands = 0 : i64, tpu.core_type = #tpu.core_type<tc>, window_params = [{transform_indices = @transform_0, window_bounds = array<i64: 1, 36, 128>}, {pipeline_mode = #tpu.pipeline_mode<synchronous>, transform_indices = @transform_1, window_bounds = array<i64: 8, 36>}, {pipeline_mode = #tpu.pipeline_mode<synchronous>, transform_indices = @transform_2, window_bounds = array<i64: 8, 1>}, {transform_indices = @transform_3, window_bounds = array<i64: 1, 8, 128>}, {transform_indices = @transform_4, window_bounds = array<i64: 1, 8, 1>}, {transform_indices = @transform_5, window_bounds = array<i64: 1, 8, 1>}]} {
    %c0 = arith.constant 0 : index
    %c0_0 = arith.constant 0 : index
    %0 = vector.load %arg3[%c0, %c0_0] : memref<8x36xbf16, #tpu.memory_space<vmem>>, vector<8x36xbf16>
    %c0_1 = arith.constant 0 : index
    %c0_2 = arith.constant 0 : index
    %c0_3 = arith.constant 0 : index
    %1 = vector.load %arg2[%c0_1, %c0_2, %c0_3] : memref<1x36x128xbf16, #tpu.memory_space<vmem>>, vector<1x36x128xbf16>
    %2 = vector.shape_cast %1 : vector<1x36x128xbf16> to vector<36x128xbf16>
    %cst = arith.constant dense<0.000000e+00> : vector<8x128xf32>
    %3 = tpu.matmul %0, %2, %cst {dimension_numbers = #tpu.dot_dimension_numbers<[1], [0], [0], [1], [0, 0, 1, 1], [], []>} : vector<8x36xbf16>, vector<36x128xbf16>, vector<8x128xf32> -> vector<8x128xf32>
    %c0_4 = arith.constant 0 : index
    %c0_5 = arith.constant 0 : index
    %4 = vector.load %arg4[%c0_4, %c0_5] : memref<8x1xf32, #tpu.memory_space<vmem>>, vector<8x1xf32>
    %5 = vector.broadcast %4 : vector<8x1xf32> to vector<8x128xf32>
    %6 = arith.addf %3, %5 : vector<8x128xf32>
    %c128_i32 = arith.constant 128 : i32
    %7 = arith.muli %arg1, %c128_i32 : i32
    %8 = tpu.iota {dimensions = array<i32: 1>} : vector<8x128xi32>
    %9 = vector.broadcast %7 : i32 to vector<8x128xi32>
    %10 = arith.addi %9, %8 : vector<8x128xi32>
    %c256_i32 = arith.constant 256 : i32
    %11 = vector.broadcast %c256_i32 : i32 to vector<8x128xi32>
    %12 = arith.cmpi slt, %10, %11 : vector<8x128xi32>
    %cst_6 = arith.constant 0.000000e+00 : f32
    %13 = vector.broadcast %cst_6 : f32 to vector<8x128xf32>
    %14 = arith.select %12, %6, %13 : vector<8x128xi1>, vector<8x128xf32>
    %c0_i32 = arith.constant 0 : i32
    %15 = arith.cmpi eq, %arg1, %c0_i32 : i32
    %16 = arith.extui %15 : i1 to i32
    %c0_i32_7 = arith.constant 0 : i32
    %17 = arith.cmpi ne, %16, %c0_i32_7 : i32
    scf.if %17 {
      %cst_25 = arith.constant 0.000000e+00 : f32
      %38 = vector.broadcast %cst_25 : f32 to vector<8x1xf32>
      %c0_26 = arith.constant 0 : index
      %c0_27 = arith.constant 0 : index
      %c0_28 = arith.constant 0 : index
      %39 = vector.load %arg6[%c0_26, %c0_27, %c0_28] : memref<1x8x1xf32, #tpu.memory_space<vmem>>, vector<1x8x1xf32>
      %40 = vector.shape_cast %39 : vector<1x8x1xf32> to vector<8x1xf32>
      %41 = vector.shape_cast %38 : vector<8x1xf32> to vector<1x8x1xf32>
      tpu.vector_store %arg6[%c0_26, %c0_27, %c0_28], %41 {strides = array<i32>} : memref<1x8x1xf32, #tpu.memory_space<vmem>>, vector<1x8x1xf32>,
      %cst_29 = arith.constant 0.000000e+00 : f32
      %42 = vector.broadcast %cst_29 : f32 to vector<8x1xf32>
      %c0_30 = arith.constant 0 : index
      %c0_31 = arith.constant 0 : index
      %c0_32 = arith.constant 0 : index
      %43 = vector.load %arg7[%c0_30, %c0_31, %c0_32] : memref<1x8x1xf32, #tpu.memory_space<vmem>>, vector<1x8x1xf32>
      %44 = vector.shape_cast %43 : vector<1x8x1xf32> to vector<8x1xf32>
      %45 = vector.shape_cast %42 : vector<8x1xf32> to vector<1x8x1xf32>
      tpu.vector_store %arg7[%c0_30, %c0_31, %c0_32], %45 {strides = array<i32>} : memref<1x8x1xf32, #tpu.memory_space<vmem>>, vector<1x8x1xf32>,
    } else {
    }
    %c0_8 = arith.constant 0 : index
    %c0_9 = arith.constant 0 : index
    %c0_10 = arith.constant 0 : index
    %18 = vector.load %arg6[%c0_8, %c0_9, %c0_10] : memref<1x8x1xf32, #tpu.memory_space<vmem>>, vector<1x8x1xf32>
    %19 = vector.shape_cast %18 : vector<1x8x1xf32> to vector<8x1xf32>
    %cst_11 = arith.constant dense<0.000000e+00> : vector<8xf32>
    %20 = vector.multi_reduction <add>, %14, %cst_11 [1] : vector<8x128xf32> to vector<8xf32>
    %21 = vector.shape_cast %20 : vector<8xf32> to vector<8x1xf32>
    %22 = arith.addf %19, %21 : vector<8x1xf32>
    %c0_12 = arith.constant 0 : index
    %c0_13 = arith.constant 0 : index
    %c0_14 = arith.constant 0 : index
    %23 = vector.load %arg6[%c0_12, %c0_13, %c0_14] : memref<1x8x1xf32, #tpu.memory_space<vmem>>, vector<1x8x1xf32>
    %24 = vector.shape_cast %23 : vector<1x8x1xf32> to vector<8x1xf32>
    %25 = vector.shape_cast %22 : vector<8x1xf32> to vector<1x8x1xf32>
    tpu.vector_store %arg6[%c0_12, %c0_13, %c0_14], %25 {strides = array<i32>} : memref<1x8x1xf32, #tpu.memory_space<vmem>>, vector<1x8x1xf32>,
    %c0_15 = arith.constant 0 : index
    %c0_16 = arith.constant 0 : index
    %c0_17 = arith.constant 0 : index
    %26 = vector.load %arg7[%c0_15, %c0_16, %c0_17] : memref<1x8x1xf32, #tpu.memory_space<vmem>>, vector<1x8x1xf32>
    %27 = vector.shape_cast %26 : vector<1x8x1xf32> to vector<8x1xf32>
    %28 = arith.mulf %14, %14 : vector<8x128xf32>
    %cst_18 = arith.constant dense<0.000000e+00> : vector<8xf32>
    %29 = vector.multi_reduction <add>, %28, %cst_18 [1] : vector<8x128xf32> to vector<8xf32>
    %30 = vector.shape_cast %29 : vector<8xf32> to vector<8x1xf32>
    %31 = arith.addf %27, %30 : vector<8x1xf32>
    %c0_19 = arith.constant 0 : index
    %c0_20 = arith.constant 0 : index
    %c0_21 = arith.constant 0 : index
    %32 = vector.load %arg7[%c0_19, %c0_20, %c0_21] : memref<1x8x1xf32, #tpu.memory_space<vmem>>, vector<1x8x1xf32>
    %33 = vector.shape_cast %32 : vector<1x8x1xf32> to vector<8x1xf32>
    %34 = vector.shape_cast %31 : vector<8x1xf32> to vector<1x8x1xf32>
    tpu.vector_store %arg7[%c0_19, %c0_20, %c0_21], %34 {strides = array<i32>} : memref<1x8x1xf32, #tpu.memory_space<vmem>>, vector<1x8x1xf32>,
    %c0_22 = arith.constant 0 : index
    %c0_23 = arith.constant 0 : index
    %c0_24 = arith.constant 0 : index
    %35 = vector.load %arg5[%c0_22, %c0_23, %c0_24] : memref<1x8x128xf32, #tpu.memory_space<vmem>>, vector<1x8x128xf32>
    %36 = vector.shape_cast %35 : vector<1x8x128xf32> to vector<8x128xf32>
    %37 = vector.shape_cast %6 : vector<8x128xf32> to vector<1x8x128xf32>
    tpu.vector_store %arg5[%c0_22, %c0_23, %c0_24], %37 {strides = array<i32>} : memref<1x8x128xf32, #tpu.memory_space<vmem>>, vector<1x8x128xf32>,
    return
  }
  func.func @transform_0(%arg0: i32, %arg1: i32) -> (i32, i32, i32) {
    %c0_i32 = arith.constant 0 : i32
    %c0_i32_0 = arith.constant 0 : i32
    return %arg0, %c0_i32, %arg1 : i32, i32, i32
  }
  func.func @transform_1(%arg0: i32, %arg1: i32) -> (i32, i32) {
    %c0_i32 = arith.constant 0 : i32
    %c0_i32_0 = arith.constant 0 : i32
    %c0_i32_1 = arith.constant 0 : i32
    return %c0_i32, %c0_i32_0 : i32, i32
  }
  func.func @transform_2(%arg0: i32, %arg1: i32) -> (i32, i32) {
    %c0_i32 = arith.constant 0 : i32
    %c0_i32_0 = arith.constant 0 : i32
    %c0_i32_1 = arith.constant 0 : i32
    return %c0_i32, %c0_i32_0 : i32, i32
  }
  func.func @transform_3(%arg0: i32, %arg1: i32) -> (i32, i32, i32) {
    %c0_i32 = arith.constant 0 : i32
    %c0_i32_0 = arith.constant 0 : i32
    return %arg0, %c0_i32, %arg1 : i32, i32, i32
  }
  func.func @transform_4(%arg0: i32, %arg1: i32) -> (i32, i32, i32) {
    %c0_i32 = arith.constant 0 : i32
    %c0_i32_0 = arith.constant 0 : i32
    %c0_i32_1 = arith.constant 0 : i32
    return %arg0, %c0_i32, %c0_i32_0 : i32, i32, i32
  }
  func.func @transform_5(%arg0: i32, %arg1: i32) -> (i32, i32, i32) {
    %c0_i32 = arith.constant 0 : i32
    %c0_i32_0 = arith.constant 0 : i32
    %c0_i32_1 = arith.constant 0 : i32
    return %arg0, %c0_i32, %c0_i32_0 : i32, i32, i32
  }
}

module attributes {stable_mosaic.version = 11 : i64} {
  func.func @_gn_relu_kernel(%arg0: i32, %arg1: i32, %arg2: memref<1x8x128xf32, #tpu.memory_space<vmem>>, %arg3: memref<1x8x1xf32, #tpu.memory_space<vmem>>, %arg4: memref<1x8x1xf32, #tpu.memory_space<vmem>>, %arg5: memref<1x8x128xf32, #tpu.memory_space<vmem>>) attributes {dimension_semantics = [#tpu.dimension_semantics<parallel>, #tpu.dimension_semantics<parallel>], iteration_bounds = array<i64: 2, 2>, scalar_prefetch = 0 : i64, scratch_operands = 0 : i64, tpu.core_type = #tpu.core_type<tc>, window_params = [{transform_indices = @transform_0, window_bounds = array<i64: 1, 8, 128>}, {transform_indices = @transform_1, window_bounds = array<i64: 1, 8, 1>}, {transform_indices = @transform_2, window_bounds = array<i64: 1, 8, 1>}, {transform_indices = @transform_3, window_bounds = array<i64: 1, 8, 128>}]} {
    %c0 = arith.constant 0 : index
    %c0_0 = arith.constant 0 : index
    %c0_1 = arith.constant 0 : index
    %0 = vector.load %arg2[%c0, %c0_0, %c0_1] : memref<1x8x128xf32, #tpu.memory_space<vmem>>, vector<1x8x128xf32>
    %1 = vector.shape_cast %0 : vector<1x8x128xf32> to vector<8x128xf32>
    %c0_2 = arith.constant 0 : index
    %c0_3 = arith.constant 0 : index
    %c0_4 = arith.constant 0 : index
    %2 = vector.load %arg3[%c0_2, %c0_3, %c0_4] : memref<1x8x1xf32, #tpu.memory_space<vmem>>, vector<1x8x1xf32>
    %3 = vector.shape_cast %2 : vector<1x8x1xf32> to vector<8x1xf32>
    %4 = vector.broadcast %3 : vector<8x1xf32> to vector<8x128xf32>
    %5 = arith.mulf %1, %4 : vector<8x128xf32>
    %c0_5 = arith.constant 0 : index
    %c0_6 = arith.constant 0 : index
    %c0_7 = arith.constant 0 : index
    %6 = vector.load %arg4[%c0_5, %c0_6, %c0_7] : memref<1x8x1xf32, #tpu.memory_space<vmem>>, vector<1x8x1xf32>
    %7 = vector.shape_cast %6 : vector<1x8x1xf32> to vector<8x1xf32>
    %8 = vector.broadcast %7 : vector<8x1xf32> to vector<8x128xf32>
    %9 = arith.addf %5, %8 : vector<8x128xf32>
    %cst = arith.constant 0.000000e+00 : f32
    %10 = vector.broadcast %cst : f32 to vector<8x128xf32>
    %11 = arith.maximumf %9, %10 : vector<8x128xf32>
    %c0_8 = arith.constant 0 : index
    %c0_9 = arith.constant 0 : index
    %c0_10 = arith.constant 0 : index
    %12 = vector.load %arg5[%c0_8, %c0_9, %c0_10] : memref<1x8x128xf32, #tpu.memory_space<vmem>>, vector<1x8x128xf32>
    %13 = vector.shape_cast %12 : vector<1x8x128xf32> to vector<8x128xf32>
    %14 = vector.shape_cast %11 : vector<8x128xf32> to vector<1x8x128xf32>
    tpu.vector_store %arg5[%c0_8, %c0_9, %c0_10], %14 {strides = array<i32>} : memref<1x8x128xf32, #tpu.memory_space<vmem>>, vector<1x8x128xf32>,
    return
  }
  func.func @transform_0(%arg0: i32, %arg1: i32) -> (i32, i32, i32) {
    %c0_i32 = arith.constant 0 : i32
    %c0_i32_0 = arith.constant 0 : i32
    return %arg0, %c0_i32, %arg1 : i32, i32, i32
  }
  func.func @transform_1(%arg0: i32, %arg1: i32) -> (i32, i32, i32) {
    %c0_i32 = arith.constant 0 : i32
    %c0_i32_0 = arith.constant 0 : i32
    %c0_i32_1 = arith.constant 0 : i32
    return %arg0, %c0_i32, %c0_i32_0 : i32, i32, i32
  }
  func.func @transform_2(%arg0: i32, %arg1: i32) -> (i32, i32, i32) {
    %c0_i32 = arith.constant 0 : i32
    %c0_i32_0 = arith.constant 0 : i32
    %c0_i32_1 = arith.constant 0 : i32
    return %arg0, %c0_i32, %c0_i32_0 : i32, i32, i32
  }
  func.func @transform_3(%arg0: i32, %arg1: i32) -> (i32, i32, i32) {
    %c0_i32 = arith.constant 0 : i32
    %c0_i32_0 = arith.constant 0 : i32
    return %arg0, %c0_i32, %arg1 : i32, i32, i32
  }
}

</mosaic_0001>

<bundles_post_ra>
// kernel: conv_gn_relu.3
= control target key start
LH: loop header
LB: loop body
LE: loop exit
PB: predicated region body
PF: predicated region fallthrough
CT: control target
= control target key end

     0   :  { %s479_s12 = smov 0   ;;  %s481_s13 = smov 0   ;;  %s536_s0 = inlined_call_operand.vmem [shape: f32[2,8,256], index: 0, kind: input, shape index: {}]   ;;  %s537_s1 = inlined_call_operand.vmem [shape: f32[2,8,1], index: 1, kind: input, shape index: {}]   ;;  %s538_s2 = inlined_call_operand.vmem [shape: f32[2,8,1], index: 2, kind: input, shape index: {}]   ;;  %s539_s3 = inlined_call_operand.vmem [shape: f32[2,8,256], index: 3, kind: output, shape index: {}]  }
   0x1   :  { %s483_s14 = smov 0   ;;  %s485_s15 = smov 0  }
   0x2   :  { %s487_s16 = smov 0  }
   0x3 LB: > { %s22_s17 = sadd.s32 1, %s448_s14  ;;  %s25_s18 = sadd.s32 1, %s452_s15  ;;  %s456_s16 = sphi %s487_s16, %s13_s16   ;;  %s452_s15 = sphi %s485_s15, %s543_s15   ;;  %s448_s14 = sphi %s483_s14, %s542_s14   ;;  %s444_s13 = sphi %s481_s13, %s541_s13   ;;  %s440_s12 = sphi %s479_s12, %s540_s12  }
   0x4   : > { %p23_p0 = scmp.ge.s32.totalorder %s22_s17, 2  ;;  %p367_p1 = scmp.ge.s32.totalorder %s456_s16, 1 }
   0x5   : > { %p174_p2 = scmp.lt.s32.totalorder %s456_s16, 5 }
   0x6   : > { %s545_s17 = smov (%p23_p0, %s22_s17), 0  ;;  %s547_s18 = smov (!%p23_p0, %s25_s18), %s452_s15 }
   0x7   : > { %p175_p3 = pnand %p367_p1, %p174_p2  ;;  %p27_p4 = scmp.ge.s32.totalorder %s547_s18, 2 }
   0x8   : > { %p212_p5 = scmp.lt.s32.totalorder (!%p175_p3), %s444_s13, 1  ;;  %v458_v0 = vmov (!%p175_p3), 0   ;;  %p214_p6 = scmp.lt.s32.totalorder (!%p175_p3), %s440_s12, 1 }
   0x9   : > { %s549_s18 = smov (%p27_p4, %s547_s18), 0  ;;  %178 = sbr.rel (%p175_p3) target bundleno = 157 (0x9d), region = 32 }
   0xa   : > { %417 = vset.pattern.permute.xlu0 (!%p175_p3), %v458_v0 }
  0x10   : > { %s551_s13 = smov (!%p212_p5, %s444_s13), 1  ;;  %s553_s12 = smov (!%p214_p6, %s440_s12), 1 }
  0x11   : > { %s370_s19 = sshll.u32 %s551_s13, 3  ;;  %s368_s26 = sshll.u32 %s551_s13, 1 }
  0x12   : > { %s223_s22 = scalar_lea.vmem %s537_s1, %s370_s19  ;;  %s227_s25 = scalar_lea.vmem %s538_s2, %s370_s19 }
  0x13   : > { %v237_v1 = vld [vmem:[%s223_s22] sm:$0xff]  ;;  %s217_s27 = sadd.s32 %s368_s26, %s553_s12 }
  0x14   : > { %240 = vperm.xlu0 %417, %v237_v1   ;;  %v244_v2 = vld [vmem:[%s227_s25] sm:$0xff]  ;;  %s369_s28 = sshll.u32 %s217_s27, 3 }
  0x15   : > { %s219_s4 = scalar_lea.vmem %s536_s0, %s369_s28  ;;  %s235_s7 = scalar_lea.vmem %s539_s3, %s369_s28 }
  0x16   : > { %v236_v4 = vld [vmem:[%s219_s4] sm:$0xff] }
  0x18   : > { %247 = vperm.xlu0 %417, %v244_v2  }
  0x93   : > { %v241_v3 = vpop.permute.xlu0 %240 }
  0x94   : > { %v243_v5 = vmul.f32 %v241_v3, %v236_v4 }
  0x97   : > { %v248_v6 = vpop.permute.xlu0 %247 }
  0x98   : > { %v250_v7 = vadd.f32 %v248_v6, %v243_v5 }
  0x9a   : > { %v251_v8 = vmax.f32 %v250_v7, 0.0 }
  0x9c   : > { %252 = vst [vmem:[%s235_s7] sm:$0xff] %v251_v8 }
  0x9d PF: > { %s13_s16 = sadd.s32 1, %s456_s16   ;;  %s540_s12 = smov %s448_s14 }
  0x9e   : > { %p10_p7 = scmp.ge.s32.totalorder %s13_s16, 6   ;;  %s541_s13 = smov %s452_s15 }
  0x9f   : > { %s542_s14 = smov %s545_s17  ;;  %s543_s15 = smov %s549_s18 }
  0xa0   :  { %12 = sbr.rel (!%p10_p7) target bundleno = 3 (0x3), region = 68 }

// kernel: conv_gn_relu.2
= control target key start
LH: loop header
LB: loop body
LE: loop exit
PB: predicated region body
PF: predicated region fallthrough
CT: control target
= control target key end

     0   :  { %s769_s18 = smov 0   ;;  %s771_s19 = smov 0   ;;  %s887_s0 = inlined_call_operand.vmem [shape: bf16[2,36,256], index: 0, kind: input, shape index: {}]   ;;  %s888_s1 = inlined_call_operand.vmem [shape: bf16[8,36], index: 1, kind: input, shape index: {}]   ;;  %s889_s2 = inlined_call_operand.vmem [shape: f32[8,1], index: 2, kind: input, shape index: {}]   ;;  %s890_s3 = inlined_call_operand.vmem [shape: f32[2,8,256], index: 3, kind: output, shape index: {0}]   ;;  %s891_s4 = inlined_call_operand.vmem [shape: f32[2,8,1], index: 4, kind: output, shape index: {1}]   ;;  %s892_s5 = inlined_call_operand.vmem [shape: f32[2,8,1], index: 5, kind: output, shape index: {2}]  }
   0x1   :  { %s773_s20 = smov 0   ;;  %s775_s21 = smov 0  }
   0x2   :  { %s777_s22 = smov 0   ;;  %s779_s23 = smov 0  }
   0x3   :  { %s781_s24 = smov 0  }
   0x4 LB: > { %s25_s25 = sadd.s32 1, %s725_s22  ;;  %s28_s26 = sadd.s32 1, %s729_s23  ;;  %s733_s24 = sphi %s781_s24, %s16_s24   ;;  %s729_s23 = sphi %s779_s23, %s898_s23   ;;  %s725_s22 = sphi %s777_s22, %s897_s22   ;;  %s721_s21 = sphi %s775_s21, %s896_s21   ;;  %s717_s20 = sphi %s773_s20, %s895_s20   ;;  %s713_s19 = sphi %s771_s19, %s894_s19   ;;  %s709_s18 = sphi %s769_s18, %s893_s18  }
   0x5   : > { %p26_p0 = scmp.ge.s32.totalorder %s25_s25, 2  ;;  %p44_p1 = scmp.ne.s32.totalorder %s713_s19, %s709_s18 }
   0x6   : > { %p45_p2 = scmp.eq.s32.totalorder %s733_s24, 0  ;;  %s37_s30 = sadd.s32 1, %s713_s19 }
   0x7   : > { %s900_s25 = smov (%p26_p0, %s25_s25), 0  ;;  %s902_s26 = smov (!%p26_p0, %s28_s26), %s729_s23 }
   0x8   : > { %p46_p3 = por %p45_p2, %p44_p1  ;;  %p30_p4 = scmp.ge.s32.totalorder %s902_s26, 2 }
   0x9   : > { %s33_s27 = ssub.s32 %s725_s22, %s900_s25  ;;  %p583_p6 = scmp.ge.s32.totalorder %s733_s24, 4 }
   0xa   : > { %s904_s26 = smov (%p30_p4, %s902_s26), 0 }
   0xb   : > { %s32_s28 = ssub.s32 %s729_s23, %s904_s26  ;;  %198 = sbr.rel (%p583_p6) target bundleno = 28 (0x1c), region = 24 }
   0xc   : > { %s34_s29 = sor.u32 %s33_s27, %s32_s28 }
   0xd   : > { %p35_p5 = scmp.eq.s32.totalorder %s34_s29, 0 }
   0xf   : > { %s820_s6 = scalar_select %p35_p5, %s713_s19, %s37_s30  }
  0x12   : > { %201 = sbr.rel (!%p46_p3) target bundleno = 28 (0x1c), region = 28  ;;  %s203_s7 = sand.u32 (%p46_p3), 1, %s713_s19  }
  0x13   : > { %s613_s8 = smul.u32 (%p46_p3), 10, %s729_s23 }
  0x14   : > { %s612_s9 = smul.u32 (%p46_p3), 20, %s203_s7 }
  0x15   : > { %s207_s10 = sadd.s32 (%p46_p3), %s725_s22, %s613_s8 }
  0x16   : > { %s584_s11 = sshll.u32 (%p46_p3), %s207_s10, 2  ;;  %s205_s15 = scalar_lea.vmem (%p46_p3), [#allocation2], %s612_s9 }
  0x17   : > { %s209_s14 = scalar_lea.vmem (%p46_p3), %s887_s0, %s584_s11 }
  0x18   : > { %v225_v0 = vld [vmem:[%s209_s14] sm:$0xf] (%p46_p3)  ;;  %v227_v1 = vld [vmem:[%s209_s14 + $0x8] sm:$0xf] (%p46_p3)  ;;  %v229_v2 = vld [vmem:[%s209_s14 + $0x10] sm:$0xf] (%p46_p3) }
  0x19   : > { %226 = vst [vmem:[%s205_s15] sm:$0xf] %v225_v0  ;;  %228 = vst [vmem:[%s205_s15 + $0x4] sm:$0xf] %v227_v1  ;;  %v231_v3 = vld [vmem:[%s209_s14 + $0x18] sm:$0xf] }
  0x1a   : > { %230 = vst [vmem:[%s205_s15 + $0x8] sm:$0xf] %v229_v2  ;;  %v233_v4 = vld [vmem:[%s209_s14 + $0x20] sm:$0xf]  ;;  %232 = vst [vmem:[%s205_s15 + $0xc] sm:$0xf] %v231_v3 }
  0x1b   : > { %234 = vst [vmem:[%s205_s15 + $0x10] sm:$0xf] %v233_v4 }
  0x1c PF: > { %p585_p7 = scmp.ge.s32.totalorder %s733_s24, 1  ;;  %p266_p8 = scmp.lt.s32.totalorder %s733_s24, 5 }
  0x1e   : > { %p267_p9 = pnand %p585_p7, %p266_p8 }
  0x1f   : > { %p311_p10 = scmp.lt.s32.totalorder (!%p267_p9), %s721_s21, 1  ;;  %p313_p11 = scmp.lt.s32.totalorder (!%p267_p9), %s717_s20, 1  ;;  %v735_v5 = vmov (!%p267_p9), 0.0   ;;  %vm736_vm0 = vmmov (!%p267_p9), 0   ;;  %v334_v6 = vld [vmem:[%s889_s2] sm:$0xff] (!%p267_p9)  ;;  %v737_v7 = vmov (!%p267_p9), 0   ;;  %v404_v13 = vlaneseq (!%p267_p9) }
  0x20   : > { %270 = sbr.rel (%p267_p9) target bundleno = 421 (0x1a5), region = 69  ;;  %602 = vmatprep.subr.bf16.mxu0 (!%p267_p9), %v735_v5  ;;  %s273_s16 = sand.u32 (!%p267_p9), 1, %s709_s18   ;;  %608 = vmatprep.mubr.msk.bf16.mxu0 (!%p267_p9), %vm736_vm0, %v735_v5  ;;  %vm359_vm1 = vcmask (!%p267_p9), 1041408   ;;  %v328_v12 = vld [vmem:[%s888_s1] sm:$0xf] (!%p267_p9)  ;;  %vm355_vm2 = vcmask (!%p267_p9), 293888  }
  0x21   : > { %675 = vset.pattern.permute.xlu0 (!%p267_p9), %v737_v7  ;;  %s614_s27 = smul.u32 (!%p267_p9), 20, %s273_s16  ;;  %s594_s16 = sshll.u32 (!%p267_p9), %s717_s20, 7  ;;  %v405_v14 = vand.u32 (!%p267_p9), 127, %v404_v13 }
  0x22   : > { %337 = vperm.xlu0 (!%p267_p9), %675, %v334_v6   ;;  %v406_v15 = vstv (!%p267_p9), %s594_s16  ;;  %p595_p12 = scmp.ne.s32.totalorder (!%p267_p9), %s717_s20, 0 }
  0x23   : > { %v407_v16 = vadd.s32 (!%p267_p9), %v406_v15, %v405_v14 }
  0x25   : > { %vm408_vm3 = vcmp.lt.s32.totalorder (!%p267_p9), %v407_v16, 256 }
  0x27   : > { %s906_s21 = smov (!%p311_p10, %s721_s21), 1  ;;  %vm414_vm4 = vcmask (!%p595_p12), 7168   ;;  %v738_v24 = vmov (!%p595_p12), 0.0  }
  0x28   : > { %s314_s28 = scalar_select %p313_p11, %s717_s20, 1 }
  0x29   : > { %s586_s29 = sshll.u32 %s906_s21, 1  ;;  %s588_s30 = sshll.u32 %s906_s21, 3 }
  0x2a   : > { %s316_s7 = sadd.s32 %s586_s29, %s314_s28  ;;  %s842_s10 = scalar_lea.vmem %s891_s4, %s588_s30 }
  0x2b   : > { %s587_s18 = sshll.u32 %s316_s7, 3  ;;  %s847_s13 = scalar_lea.vmem %s892_s5, %s588_s30  ;;  %415 = vst.msk [vmem:[%s842_s10] sm:$0xff] (!%p595_p12), %vm414_vm4, %v738_v24 }
  0x2c   : > { %s852_s17 = scalar_lea.vmem %s890_s3, %s587_s18  ;;  %s275_s21 = scalar_lea.vmem [#allocation2], %s614_s27  ;;  %416 = vst.msk [vmem:[%s847_s13] sm:$0xff] (!%p595_p12), %vm414_vm4, %v738_v24 }
  0x2d   : > { %v676_v8 = vld [vmem:[%s275_s21] sm:$0xff]   ;;  %v677_v9 = vld [vmem:[%s275_s21 + $0x8] sm:$0xff]   ;;  %v678_v10 = vld [vmem:[%s275_s21 + $0x10] ss:$0 sps:$4 sm:$0x33]  }
  0x2e   : > { %603 = vmatpush3.bf16.msra.mxu0 %v676_v8  ;;  %v361_v11 = vsel %vm359_vm1, %v678_v10, 0 }
  0x2f   : > { %604 = vmatprep.subr.bf16.mxu0 %v735_v5 }
  0x32   : > { %605 = vmatpush3.bf16.msra.mxu0 %v677_v9 }
  0x33   : > { %606 = vmatprep.subr.bf16.mxu0 %v735_v5 }
  0x36   : > { %607 = vmatpush3.bf16.msra.mxu0 %v361_v11 }
  0x39   : > { %609 = vmatmul.mubr.msk.bf16.vlgmr.msra.gmra.mrb[0].mxu0 %vm355_vm2, %v328_v12 }
  0xa1   : > { %v338_v17 = vpop.permute.xlu0 %337 }
 0x109   : > { %413 = sbr.rel (%p595_p12) target bundleno = 272 (0x110), region = 77 }
 0x10c   : > { %v397_v18 = vpop.f32.mrb[0].mxu0 }
 0x10d   : > { %v398_v19 = vadd.f32 %v397_v18, %v338_v17  ;;  %v610_v20 = vpop.f32.mrb[1].mxu0 }
 0x10e   : > { %v400_v21 = vpop.f32.mrb[2].mxu0 }
 0x10f   : > { %v409_v22 = vsel %vm408_vm3, %v398_v19, 0.0  ;;  %v611_v23 = vpop.f32.mrb[3].mxu0 }
 0x110 PF: > { %418 = vadd.xlane.f32.xlu0 %v409_v22  ;;  %v424_v25 = vmul.f32 %v409_v22, %v409_v22  ;;  %429 = vst [vmem:[%s852_s17] sm:$0xff] %v398_v19  ;;  %v417_v26 = vld [vmem:[%s842_s10] sm:$0xff]  ;;  %vm421_vm5 = vcmask 7168  }
 0x111   : > { %v423_v29 = vld [vmem:[%s847_s13] sm:$0xff] }
 0x114   : > { %425 = vadd.xlane.f32.xlu0 %v424_v25 }
 0x19d   : > { %v419_v27 = vpop.xlane.xlu0 %418 }
 0x19e   : > { %v420_v28 = vadd.f32 %v419_v27, %v417_v26 }
 0x1a0   : > { %422 = vst.msk [vmem:[%s842_s10] sm:$0xff] %vm421_vm5, %v420_v28 }
 0x1a1   : > { %v426_v30 = vpop.xlane.xlu0 %425 }
 0x1a2   : > { %v427_v31 = vadd.f32 %v426_v30, %v423_v29 }
 0x1a4   : > { %428 = vst.msk [vmem:[%s847_s13] sm:$0xff] %vm421_vm5, %v427_v31 }
 0x1a5 PF: > { %s16_s24 = sadd.s32 1, %s733_s24   ;;  %s893_s18 = smov %s713_s19 }
 0x1a6   : > { %p13_p13 = scmp.ge.s32.totalorder %s16_s24, 6   ;;  %s894_s19 = smov %s820_s6 }
 0x1a7   : > { %s895_s20 = smov %s725_s22  ;;  %s896_s21 = smov %s729_s23 }
 0x1a8   : > { %s897_s22 = smov %s900_s25  ;;  %s898_s23 = smov %s904_s26 }
 0x1a9   :  { %15 = sbr.rel (!%p13_p13) target bundleno = 4 (0x4), region = 136 }

</bundles_post_ra>
